<compile_context>
chip_gen: v7x
topology: tpu7x:2x2x1
jax: 0.10.0
libtpu: 0.0.40
codegen_flags: <defaults>
</compile_context>

<pallas_src>
import functools

import jax
import jax.numpy as jnp
from jax.experimental import pallas as pl
from jax.experimental.pallas import tpu as pltpu


def _round_up(n, m):
    return ((n + m - 1) // m) * m


def projection_kernel(x_ref, w1_ref, b1_ref, w2_ref, b2_ref, o_ref):
    # x_ref : (BT, IN_pad)     f32   streamed per grid step
    # w1_ref: (IN_pad, HID_pad) bf16  VMEM-resident across the grid
    # b1_ref: (1, HID_pad)     f32
    # w2_ref: (HID_pad, OUT_pad) bf16 VMEM-resident across the grid
    # b2_ref: (1, OUT_pad)     f32
    # o_ref : (BT, OUT_pad)    f32
    x = x_ref[...].astype(jnp.bfloat16)

    # fc1: bf16 operands on the MXU, f32 accumulation; bias + ReLU in f32 (VPU).
    h = jnp.dot(x, w1_ref[...], preferred_element_type=jnp.float32) + b1_ref[...]
    h = jnp.maximum(h, 0.0)

    # fc2: bf16 operands, f32 accumulation, f32 bias add.
    y = jnp.dot(h.astype(jnp.bfloat16), w2_ref[...],
                preferred_element_type=jnp.float32) + b2_ref[...]
    o_ref[...] = y.astype(o_ref.dtype)


@functools.partial(jax.jit, static_argnames=("block_b",))
def projection_forward(x, w1, b1, w2, b2, *, block_b=512):
    """x: (B, IN) f32; w1: (IN, HID); b1: (1, HID); w2: (HID, OUT); b2: (1, OUT).

    Returns (B, OUT) f32, matching the PyTorch module's forward.
    """
    B, IN = x.shape
    HID = w1.shape[1]
    OUT = w2.shape[1]

    # Lane-dense padding (multiples of 128 on the lane axis).
    IN_p = _round_up(IN, 128)
    HID_p = _round_up(HID, 128)
    OUT_p = _round_up(OUT, 128)

    # Batch tile: multiple of 8 sublanes, capped at block_b rows.
    if B <= block_b:
        bt = _round_up(max(B, 8), 8)
    else:
        bt = block_b
    B_p = _round_up(B, bt)

    # Zero-pad operands. Zero pads contribute 0 to both dots, padded hidden
    # bias entries are 0 (ReLU(0)=0), padded output columns / batch rows are
    # sliced off below.
    x_p = jnp.zeros((B_p, IN_p), jnp.float32).at[:B, :IN].set(x)
    w1_p = (jnp.zeros((IN_p, HID_p), jnp.bfloat16)
            .at[:IN, :HID].set(w1.astype(jnp.bfloat16)))
    b1_p = jnp.zeros((1, HID_p), jnp.float32).at[:, :HID].set(b1.reshape(1, HID))
    w2_p = (jnp.zeros((HID_p, OUT_p), jnp.bfloat16)
            .at[:HID, :OUT].set(w2.astype(jnp.bfloat16)))
    b2_p = jnp.zeros((1, OUT_p), jnp.float32).at[:, :OUT].set(b2.reshape(1, OUT))

    grid = (B_p // bt,)

    out_p = pl.pallas_call(
        projection_kernel,
        out_shape=jax.ShapeDtypeStruct((B_p, OUT_p), jnp.float32),
        grid_spec=pltpu.PrefetchScalarGridSpec(
            num_scalar_prefetch=0,
            grid=grid,
            in_specs=[
                pl.BlockSpec((bt, IN_p), lambda i: (i, 0)),        # streamed x
                pl.BlockSpec((IN_p, HID_p), lambda i: (0, 0)),     # resident w1
                pl.BlockSpec((1, HID_p), lambda i: (0, 0)),        # resident b1
                pl.BlockSpec((HID_p, OUT_p), lambda i: (0, 0)),    # resident w2
                pl.BlockSpec((1, OUT_p), lambda i: (0, 0)),        # resident b2
            ],
            out_specs=pl.BlockSpec((bt, OUT_p), lambda i: (i, 0)),
        ),
        compiler_params=pltpu.CompilerParams(
            dimension_semantics=("parallel",),   # shard batch grid across TCs (v7x)
        ),
    )(x_p, w1_p, b1_p, w2_p, b2_p)

    return out_p[:B, :OUT]


def init_params(key, in_features, out_features):
    """Deterministic parameter init matching the module's shapes.

    gap = in_features - out_features
    hidden = in_features - gap // 2
    """
    gap = in_features - out_features
    hidden = in_features - gap // 2
    k1, k2, k3, k4 = jax.random.split(key, 4)
    # 1/sqrt(fan_in) uniform scale like PyTorch's default Linear init.
    lim1 = 1.0 / jnp.sqrt(jnp.float32(in_features))
    lim2 = 1.0 / jnp.sqrt(jnp.float32(hidden))
    w1 = jax.random.uniform(k1, (in_features, hidden), jnp.float32, -lim1, lim1)
    b1 = jax.random.uniform(k2, (1, hidden), jnp.float32, -lim1, lim1)
    w2 = jax.random.uniform(k3, (hidden, out_features), jnp.float32, -lim2, lim2)
    b2 = jax.random.uniform(k4, (1, out_features), jnp.float32, -lim2, lim2)
    return w1, b1, w2, b2


if __name__ == "__main__":
    # NOTE: at sizes this small the honest fastest path is letting XLA fuse a
    # plain jnp expression; the kernel is structured so it scales to real
    # batch / feature sizes (batch grid, resident weights, lane-dense output).
    in_features = 32
    out_features = 16
    batch = 8

    key = jax.random.PRNGKey(0)
    kx, kp = jax.random.split(key)
    x = jax.random.normal(kx, (batch, in_features), jnp.float32)
    w1, b1, w2, b2 = init_params(kp, in_features, out_features)

    out = projection_forward(x, w1, b1, w2, b2)
    out = jax.block_until_ready(out)
    assert out.shape == (batch, out_features)

    # Reference mirroring the kernel's bf16-operand / f32-accumulate math.
    h_ref = jnp.dot(x.astype(jnp.bfloat16), w1.astype(jnp.bfloat16),
                    preferred_element_type=jnp.float32) + b1
    h_ref = jnp.maximum(h_ref, 0.0)
    ref_bf16 = jnp.dot(h_ref.astype(jnp.bfloat16), w2.astype(jnp.bfloat16),
                       preferred_element_type=jnp.float32) + b2
    assert jnp.allclose(out, ref_bf16, atol=1e-2, rtol=1e-2)

    # Sanity check against the exact f32 module math (loose tol: bf16 operands).
    ref_f32 = jnp.maximum(x @ w1 + b1, 0.0) @ w2 + b2
    assert jnp.allclose(out, ref_f32, atol=5e-2, rtol=5e-2)

    print("KERNEL_OK")
</pallas_src>

<mosaic_0001>
module attributes {stable_mosaic.version = 11 : i64} {
  func.func @projection_kernel(%arg0: i32, %arg1: memref<8x128xf32, #tpu.memory_space<vmem>>, %arg2: memref<128x128xbf16, #tpu.memory_space<vmem>>, %arg3: memref<1x128xf32, #tpu.memory_space<vmem>>, %arg4: memref<128x128xbf16, #tpu.memory_space<vmem>>, %arg5: memref<1x128xf32, #tpu.memory_space<vmem>>, %arg6: memref<8x128xf32, #tpu.memory_space<vmem>>) attributes {dimension_semantics = [#tpu.dimension_semantics<parallel>], iteration_bounds = array<i64: 1>, scalar_prefetch = 0 : i64, scratch_operands = 0 : i64, tpu.core_type = #tpu.core_type<tc>, window_params = [{transform_indices = @transform_0, window_bounds = array<i64: 8, 128>}, {pipeline_mode = #tpu.pipeline_mode<synchronous>, transform_indices = @transform_1, window_bounds = array<i64: 128, 128>}, {pipeline_mode = #tpu.pipeline_mode<synchronous>, transform_indices = @transform_2, window_bounds = array<i64: 1, 128>}, {pipeline_mode = #tpu.pipeline_mode<synchronous>, transform_indices = @transform_3, window_bounds = array<i64: 128, 128>}, {pipeline_mode = #tpu.pipeline_mode<synchronous>, transform_indices = @transform_4, window_bounds = array<i64: 1, 128>}, {transform_indices = @transform_5, window_bounds = array<i64: 8, 128>}]} {
    %c0 = arith.constant 0 : index
    %c0_0 = arith.constant 0 : index
    %0 = vector.load %arg1[%c0, %c0_0] : memref<8x128xf32, #tpu.memory_space<vmem>>, vector<8x128xf32>
    %1 = arith.truncf %0 : vector<8x128xf32> to vector<8x128xbf16>
    %c0_1 = arith.constant 0 : index
    %c0_2 = arith.constant 0 : index
    %2 = vector.load %arg2[%c0_1, %c0_2] : memref<128x128xbf16, #tpu.memory_space<vmem>>, vector<128x128xbf16>
    %cst = arith.constant dense<0.000000e+00> : vector<8x128xf32>
    %3 = tpu.matmul %1, %2, %cst {dimension_numbers = #tpu.dot_dimension_numbers<[1], [0], [0], [1], [0, 0, 1, 1], [], []>} : vector<8x128xbf16>, vector<128x128xbf16>, vector<8x128xf32> -> vector<8x128xf32>
    %c0_3 = arith.constant 0 : index
    %c0_4 = arith.constant 0 : index
    %4 = vector.load %arg3[%c0_3, %c0_4] : memref<1x128xf32, #tpu.memory_space<vmem>>, vector<1x128xf32>
    %5 = vector.broadcast %4 : vector<1x128xf32> to vector<8x128xf32>
    %6 = arith.addf %3, %5 : vector<8x128xf32>
    %cst_5 = arith.constant 0.000000e+00 : f32
    %7 = vector.broadcast %cst_5 : f32 to vector<8x128xf32>
    %8 = arith.maximumf %6, %7 : vector<8x128xf32>
    %9 = arith.truncf %8 : vector<8x128xf32> to vector<8x128xbf16>
    %c0_6 = arith.constant 0 : index
    %c0_7 = arith.constant 0 : index
    %10 = vector.load %arg4[%c0_6, %c0_7] : memref<128x128xbf16, #tpu.memory_space<vmem>>, vector<128x128xbf16>
    %cst_8 = arith.constant dense<0.000000e+00> : vector<8x128xf32>
    %11 = tpu.matmul %9, %10, %cst_8 {dimension_numbers = #tpu.dot_dimension_numbers<[1], [0], [0], [1], [0, 0, 1, 1], [], []>} : vector<8x128xbf16>, vector<128x128xbf16>, vector<8x128xf32> -> vector<8x128xf32>
    %c0_9 = arith.constant 0 : index
    %c0_10 = arith.constant 0 : index
    %12 = vector.load %arg5[%c0_9, %c0_10] : memref<1x128xf32, #tpu.memory_space<vmem>>, vector<1x128xf32>
    %13 = vector.broadcast %12 : vector<1x128xf32> to vector<8x128xf32>
    %14 = arith.addf %11, %13 : vector<8x128xf32>
    %c0_11 = arith.constant 0 : index
    %c0_12 = arith.constant 0 : index
    %15 = vector.load %arg6[%c0_11, %c0_12] : memref<8x128xf32, #tpu.memory_space<vmem>>, vector<8x128xf32>
    tpu.vector_store %arg6[%c0_11, %c0_12], %14 {strides = array<i32>} : memref<8x128xf32, #tpu.memory_space<vmem>>, vector<8x128xf32>,
    return
  }
  func.func @transform_0(%arg0: i32) -> (i32, i32) {
    %c0_i32 = arith.constant 0 : i32
    %c0_i32_0 = arith.constant 0 : i32
    return %arg0, %c0_i32 : i32, i32
  }
  func.func @transform_1(%arg0: i32) -> (i32, i32) {
    %c0_i32 = arith.constant 0 : i32
    %c0_i32_0 = arith.constant 0 : i32
    %c0_i32_1 = arith.constant 0 : i32
    return %c0_i32, %c0_i32_0 : i32, i32
  }
  func.func @transform_2(%arg0: i32) -> (i32, i32) {
    %c0_i32 = arith.constant 0 : i32
    %c0_i32_0 = arith.constant 0 : i32
    %c0_i32_1 = arith.constant 0 : i32
    return %c0_i32, %c0_i32_0 : i32, i32
  }
  func.func @transform_3(%arg0: i32) -> (i32, i32) {
    %c0_i32 = arith.constant 0 : i32
    %c0_i32_0 = arith.constant 0 : i32
    %c0_i32_1 = arith.constant 0 : i32
    return %c0_i32, %c0_i32_0 : i32, i32
  }
  func.func @transform_4(%arg0: i32) -> (i32, i32) {
    %c0_i32 = arith.constant 0 : i32
    %c0_i32_0 = arith.constant 0 : i32
    %c0_i32_1 = arith.constant 0 : i32
    return %c0_i32, %c0_i32_0 : i32, i32
  }
  func.func @transform_5(%arg0: i32) -> (i32, i32) {
    %c0_i32 = arith.constant 0 : i32
    %c0_i32_0 = arith.constant 0 : i32
    return %arg0, %c0_i32 : i32, i32
  }
}

</mosaic_0001>

<bundles_post_ra>
// kernel: projection_forward.1
= control target key start
LH: loop header
LB: loop body
LE: loop exit
PB: predicated region body
PF: predicated region fallthrough
CT: control target
= control target key end

     0   :  { %v382_v1 = vmov 0.0   ;;  %vm383_vm0 = vmmov 0   ;;  %s484_s0 = inlined_call_operand.vmem [shape: f32[8,128], index: 0, kind: input, shape index: {}]   ;;  %s485_s1 = inlined_call_operand.vmem [shape: bf16[128,128], index: 1, kind: input, shape index: {}]   ;;  %s486_s2 = inlined_call_operand.vmem [shape: f32[1,128], index: 2, kind: input, shape index: {}]   ;;  %s487_s3 = inlined_call_operand.vmem [shape: bf16[128,128], index: 3, kind: input, shape index: {}]   ;;  %s488_s4 = inlined_call_operand.vmem [shape: f32[1,128], index: 4, kind: input, shape index: {}]   ;;  %s489_s5 = inlined_call_operand.hbm [shape: f32[8,128], index: 5, kind: output, shape index: {}]  }
   0x1   :  { %v342_v0 = vld [vmem:[%s485_s1] sm:$0xff]   ;;  %299 = vmatprep.subr.bf16.mxu0 %v382_v1  ;;  %319 = vmatprep.subr.bf16.mxu1 %v382_v1  ;;  %v343_v2 = vld [vmem:[%s485_s1 + $0x8] sm:$0xff]   ;;  %v344_v3 = vld [vmem:[%s485_s1 + $0x10] sm:$0xff]  }
   0x2   :  { %300 = vmatpush3.bf16.msra.mxu0 %v342_v0  ;;  %315 = vmatprep.mubr.msk.bf16.mxu0 %vm383_vm0, %v382_v1  ;;  %v350_v4 = vld [vmem:[%s487_s3] sm:$0xff]   ;;  %v345_v5 = vld [vmem:[%s485_s1 + $0x18] sm:$0xff]   ;;  %v351_v6 = vld [vmem:[%s487_s3 + $0x8] sm:$0xff]  }
   0x3   :  { %301 = vmatprep.subr.bf16.mxu0 %v382_v1  ;;  %335 = vmatprep.mubr.msk.bf16.mxu1 %vm383_vm0, %v382_v1  ;;  %v346_v7 = vld [vmem:[%s485_s1 + $0x20] sm:$0xff]   ;;  %v352_v8 = vld [vmem:[%s487_s3 + $0x10] sm:$0xff]  }
   0x4   :  { %320 = vmatpush3.bf16.msra.mxu1 %v350_v4 }
   0x5   :  { %321 = vmatprep.subr.bf16.mxu1 %v382_v1 }
   0x6   :  { %302 = vmatpush3.bf16.msra.mxu0 %v343_v2 }
   0x7   :  { %303 = vmatprep.subr.bf16.mxu0 %v382_v1 }
   0x8   :  { %322 = vmatpush3.bf16.msra.mxu1 %v351_v6 }
   0x9   :  { %323 = vmatprep.subr.bf16.mxu1 %v382_v1 }
   0xa   :  { %304 = vmatpush3.bf16.msra.mxu0 %v344_v3 }
   0xb   :  { %305 = vmatprep.subr.bf16.mxu0 %v382_v1 }
   0xe   :  { %306 = vmatpush3.bf16.msra.mxu0 %v345_v5 }
   0xf   :  { %307 = vmatprep.subr.bf16.mxu0 %v382_v1 }
  0x10   :  { %10 = vsyncpa [#allocation3], 0  ;;  %v347_v9 = vld [vmem:[%s485_s1 + $0x28] sm:$0xff]   ;;  %324 = vmatpush3.bf16.msra.mxu1 %v352_v8  ;;  %v353_v10 = vld [vmem:[%s487_s3 + $0x18] sm:$0xff]   ;;  %s384_s29 = smov [#allocation2]  }
  0x11   :  { %325 = vmatprep.subr.bf16.mxu1 %v382_v1  ;;  %v348_v11 = vld [vmem:[%s485_s1 + $0x30] sm:$0xff]   ;;  %v354_v12 = vld [vmem:[%s487_s3 + $0x20] sm:$0xff]   ;;  %v349_v13 = vld [vmem:[%s485_s1 + $0x38] sm:$0xff]   ;;  %s255_s30 = sshll.u32 %s384_s29, 4  ;;  %s256_s30 = int_to_ptr.vmem [resolvable:$true] %s255_s30 }
  0x12   :  { %308 = vmatpush3.bf16.msra.mxu0 %v346_v7  ;;  %v22_v14 = vld [vmem:[%s484_s0] sm:$0xff]  ;;  %v355_v15 = vld [vmem:[%s487_s3 + $0x28] sm:$0xff]   ;;  %v356_v17 = vld [vmem:[%s487_s3 + $0x30] sm:$0xff]   ;;  %p363_p1 = scmp.lt.s32.totalorder %s256_s30, %s256_s30 }
  0x13   :  { %309 = vmatprep.subr.bf16.mxu0 %v382_v1  ;;  %v23_v16 = vpack.c.bf16 %v22_v14, %v22_v14  ;;  %v357_v18 = vld [vmem:[%s487_s3 + $0x38] sm:$0xff]   ;;  %v263_v19 = vld [vmem:[%s486_s2] ss:$0 sm:$0xff]  ;;  %s358_s2 = scalar_lea.vmem %s256_s30, 128 }
  0x14   :  { %326 = vmatpush3.bf16.msra.mxu1 %v353_v10  ;;  %v272_v27 = vld [vmem:[%s488_s4] ss:$0 sm:$0xff]  ;;  %p359_p0 = scmp.ne.s32.totalorder %s256_s30, %s358_s2  ;;  %p364_p2 = scmp.lt.s32.totalorder %s358_s2, %s358_s2 }
  0x15   :  { %327 = vmatprep.subr.bf16.mxu1 %v382_v1 }
  0x16   :  { %310 = vmatpush3.bf16.msra.mxu0 %v347_v9  ;;  %p365_p3 = por %p364_p2, %p363_p1 }
  0x17   :  { %311 = vmatprep.subr.bf16.mxu0 %v382_v1 }
  0x18   :  { %328 = vmatpush3.bf16.msra.mxu1 %v354_v12  ;;  %p366_p4 = pnand %p365_p3, %p359_p0 }
  0x19   :  { %329 = vmatprep.subr.bf16.mxu1 %v382_v1 }
  0x1a   :  { %312 = vmatpush3.bf16.msra.mxu0 %v348_v11 }
  0x1b   :  { %313 = vmatprep.subr.bf16.mxu0 %v382_v1 }
  0x1c   :  { %330 = vmatpush3.bf16.msra.mxu1 %v355_v15 }
  0x1d   :  { %331 = vmatprep.subr.bf16.mxu1 %v382_v1 }
  0x1e   :  { %314 = vmatpush3.bf16.msra.mxu0 %v349_v13 }
  0x20   :  { %332 = vmatpush3.bf16.msra.mxu1 %v356_v17 }
  0x21   :  { %316 = vmatmul.mubr.bf16.vlgmr.msra.gmra.mrb[0].mxu0 %v23_v16  ;;  %333 = vmatprep.subr.bf16.mxu1 %v382_v1 }
  0x24   :  { %334 = vmatpush3.bf16.msra.mxu1 %v357_v18 }
  0xf4   :  { %v129_v20 = vpop.f32.mrb[0].mxu0 }
  0xf5   :  { %v130_v21 = vadd.f32 %v263_v19, %v129_v20  ;;  %v317_v22 = vpop.f32.mrb[1].mxu0 }
  0xf6   :  { %v132_v23 = vpop.f32.mrb[2].mxu0 }
  0xf7   :  { %v135_v24 = vmax.f32 %v130_v21, 0.0  ;;  %v318_v25 = vpop.f32.mrb[3].mxu0 }
  0xf9   :  { %v136_v26 = vpack.c.bf16 %v135_v24, %v135_v24 }
  0xfb   :  { %336 = vmatmul.mubr.bf16.vlgmr.msra.gmra.mrb[0].mxu1 %v136_v26 }
 0x1ce   :  { %v242_v28 = vpop.f32.mrb[0].mxu1 }
 0x1cf   :  { %v243_v29 = vadd.f32 %v272_v27, %v242_v28  ;;  %v337_v30 = vpop.f32.mrb[1].mxu1 }
 0x1d0   :  { %v245_v31 = vpop.f32.mrb[2].mxu1 }
 0x1d1   :  { %248 = vst [vmem:[#allocation2] sm:$0xff] %v243_v29  ;;  %v338_v32 = vpop.f32.mrb[3].mxu1 }
 0x1d2   :  { %369 = shalt.err (!%p366_p4)
}
 0x1d3   :  { %s370_s4 = scalar_lea.hbm %s489_s5, 128 }
 0x1d4   :  { %p371_p5 = scmp.ne.s32.totalorder %s489_s5, %s370_s4  ;;  %p374_p6 = scmp.lt.u32.totalorder %s370_s4, %s489_s5 }
 0x1d6   :  { %p376_p7 = pnand %p374_p6, %p371_p5 }
 0x1d8   :  { %379 = shalt.err (!%p376_p7)
}
 0x1d9   :  { %258 = dma.vmem_to_hbm [thread:$0]  %s256_s30, 128, %s489_s5, [#allocation3]  }
 0x1da   :  { %380 = dma.done.wait [#allocation3], 128  }
 0x1db   :  { %381 = vsyncadd [#allocation3], 4294967168 }
 0x1dc   :  { %262 = vsyncpa [#allocation3], 1 }

</bundles_post_ra>
